<compile_context>
chip_gen: v7x
topology: tpu7x:2x2x1
jax: 0.10.0
libtpu: 0.0.40
codegen_flags: <defaults>
</compile_context>

<pallas_src>
import functools

import jax
import jax.numpy as jnp
import numpy as np
from jax import lax
from jax.experimental import pallas as pl
from jax.experimental.pallas import tpu as pltpu

_LANE = 128
_SUBLANE = 8
_INV_SQRT2 = np.float32(1.0 / np.sqrt(2.0))


def _round_up(n, m):
    return ((n + m - 1) // m) * m


def _pad_to(a, shape):
    if tuple(a.shape) == tuple(shape):
        return a
    return jnp.pad(a, [(0, s - d) for d, s in zip(a.shape, shape)])


def _gelu_exact(x):
    # Exact GELU: 0.5 * x * (1 + erf(x / sqrt(2)))  (matches nn.GELU default)
    return 0.5 * x * (1.0 + lax.erf(x * _INV_SQRT2))


def _vmem_capacity_bytes():
    try:
        return int(pltpu.get_tpu_info().vmem_capacity_bytes)
    except Exception:
        return 64 * 1024 * 1024  # conservative fallback (v7x per-core VMEM)


def mixer_kernel(
    x_ref,                       # (Bb, Tp, Hp) f32
    g1_ref, be1_ref,             # (1, Hp) layernorm1 gamma/beta (zero-padded)
    tw1_ref, tb1_ref,            # (Tip, Tp) [compute dtype], (Tip, 1) f32
    tw2_ref, tb2_ref,            # (Tp, Tip) [compute dtype], (Tp, 1) f32
    g2_ref, be2_ref,             # (1, Hp) layernorm2 gamma/beta (zero-padded)
    cw1t_ref, cb1_ref,           # (Hp, Hip) [compute dtype], (1, Hip) f32
    cw2t_ref, cb2_ref,           # (Hip, Hp) [compute dtype], (1, Hp) f32
    o_ref,                       # (Bb, Tp, Hp)
    *, h_real, compute_dtype,
):
    bb, t, hp = x_ref.shape
    cdt = compute_dtype
    inv_h = np.float32(1.0 / h_real)

    if hp != h_real:
        h_mask = lax.broadcasted_iota(jnp.int32, (1, hp), 1) < h_real
    else:
        h_mask = None

    def layernorm(v, g, b):
        # Centered two-pass LayerNorm (PyTorch semantics, eps=1e-5).  Padded H
        # lanes are masked out of both reductions so statistics use only the
        # real H features; gamma/beta are zero-padded so padded output lanes
        # stay exactly 0.
        vm = v if h_mask is None else jnp.where(h_mask, v, 0.0)
        mu = jnp.sum(vm, axis=-1, keepdims=True) * inv_h
        d = vm - mu
        if h_mask is not None:
            d = jnp.where(h_mask, d, 0.0)
        var = jnp.sum(d * d, axis=-1, keepdims=True) * inv_h
        return d * lax.rsqrt(var + 1e-5) * g + b

    # (bb, t, hp) -> (bb*t, hp) is a free view: t % 8 == 0, hp % 128 == 0.
    x2 = x_ref[...].reshape(bb * t, hp)

    # --- y = LayerNorm1(x) on the folded rows ---
    y2 = layernorm(x2, g1_ref[...], be1_ref[...])          # f32, padded lanes 0

    # --- token-mixing MLP as two lane-dense matmuls ---
    # Column block b of y_wide is y[b] (t, hp); both matmuls then run once with
    # N = bb*hp (single weight push each) instead of bb batched tiny matmuls.
    # All slice/concat boundaries are (8, 128)-aligned.
    if bb == 1:
        y_wide = y2
    else:
        y_wide = jnp.concatenate(
            [y2[b * t:(b + 1) * t, :] for b in range(bb)], axis=1)

    u = jnp.dot(tw1_ref[...], y_wide.astype(cdt),
                preferred_element_type=jnp.float32)        # (Tip, bb*hp)
    u = _gelu_exact(u + tb1_ref[...])
    y_mix_wide = jnp.dot(tw2_ref[...], u.astype(cdt),
                         preferred_element_type=jnp.float32) + tb2_ref[...]

    if bb == 1:
        y_mix2 = y_mix_wide
    else:
        y_mix2 = jnp.concatenate(
            [y_mix_wide[:, b * hp:(b + 1) * hp] for b in range(bb)], axis=0)

    # --- residual, LayerNorm2, channel MLP over H (folded rows, lane-dense) ---
    # y_mix2's padded H lanes are nonzero (token-MLP bias leak); the masked
    # reductions inside layernorm() keep LN2 statistics exact regardless.
    z_in2 = x2 + y_mix2
    z2 = layernorm(z_in2, g2_ref[...], be2_ref[...])       # padded lanes 0
    h2 = jnp.dot(z2.astype(cdt), cw1t_ref[...],
                 preferred_element_type=jnp.float32) + cb1_ref[...]
    h2 = _gelu_exact(h2)
    zc = jnp.dot(h2.astype(cdt), cw2t_ref[...],
                 preferred_element_type=jnp.float32) + cb2_ref[...]

    # out = x + y + z == z_in + z   (reuse residual; saves one full-tile add)
    o_ref[...] = (z_in2 + zc).reshape(bb, t, hp).astype(o_ref.dtype)


def _const_weight_spec(shape):
    index_map = lambda b: tuple(0 for _ in shape)
    try:
        # Constant-index weight blocks are never re-fetched; single-buffering
        # halves their VMEM footprint (matters on v7x's 64 MiB VMEM).
        return pl.BlockSpec(shape, index_map, pipeline_mode=pl.Buffered(1))
    except Exception:  # Pallas version without pipeline_mode / Buffered
        return pl.BlockSpec(shape, index_map)


def mixer_layer(x, params, *, block_b=None, compute_dtype=jnp.bfloat16):
    """x: (B, T, H) float32.  params: dict of weight arrays (see make_params).

    MXU operands default to bf16 on every TPU generation (f32 accumulation;
    LayerNorm/GELU stay f32).  Pass compute_dtype=jnp.float32 for bit-closer
    numerics.
    """
    B, T, H = x.shape
    Ti = params["tw1"].shape[0]
    Hi = params["cw1t"].shape[1]
    Tp = _round_up(T, _SUBLANE)     # free in-kernel (Bb,T,Hp)->(Bb*T,Hp) views
    Tip = _round_up(Ti, _SUBLANE)
    Hp = _round_up(H, _LANE)        # lane-dense blocks & unmasked output stores
    Hip = _round_up(Hi, _LANE)
    cdt = compute_dtype

    # Zero padding keeps the math exact: padded tw1 cols / tw2 rows / biases
    # are zero, gelu(0) == 0, and zero-padded gamma/beta + masked LN reductions
    # keep padded H lanes inert.  Padded T rows are independent and sliced off.
    xp = _pad_to(x, (B, Tp, Hp))
    g1 = _pad_to(params["g1"], (1, Hp))
    be1 = _pad_to(params["be1"], (1, Hp))
    g2 = _pad_to(params["g2"], (1, Hp))
    be2 = _pad_to(params["be2"], (1, Hp))
    tw1 = _pad_to(params["tw1"], (Tip, Tp)).astype(cdt)
    tb1 = _pad_to(params["tb1"], (Tip, 1))
    tw2 = _pad_to(params["tw2"], (Tp, Tip)).astype(cdt)
    tb2 = _pad_to(params["tb2"], (Tp, 1))
    cw1t = _pad_to(params["cw1t"], (Hp, Hip)).astype(cdt)
    cb1 = _pad_to(params["cb1"], (1, Hip))
    cw2t = _pad_to(params["cw2t"], (Hip, Hp)).astype(cdt)
    cb2 = _pad_to(params["cb2"], (1, Hp))
    weight_args = (g1, be1, tw1, tb1, tw2, tb2, g2, be2, cw1t, cb1, cw2t, cb2)
    weight_bytes = sum(int(np.prod(w.shape)) * w.dtype.itemsize for w in weight_args)

    # --- generation-aware VMEM budget and batch blocking ---
    vmem_cap = _vmem_capacity_bytes()                 # 128 MiB v5e/v6e, 64 MiB v7x
    vmem_limit = min(max(vmem_cap // 2, 32 << 20), 64 << 20)
    # Per-batch-row f32 footprint: 2-in + 2-out pipeline buffers of the
    # (1, Tp, Hp) block, plus live temps (y2/y_wide, y_mix, z_in, z2, h2, zc)
    # and the wide token-MLP hidden u.
    per_b = 4 * (4 * Tp * Hp                 # pipeline buffers
                 + Tp * (6 * Hp + 2 * Hip)   # row-folded f32 temps
                 + 2 * Tip * Hp)             # token-MLP hidden (wide)
    if block_b is None:
        budget = vmem_limit - 2 * weight_bytes - (8 << 20)   # headroom / spills
        cap = max(1, budget // per_b)
        if B > 1:
            cap = min(cap, B // 2)   # >=2 grid steps: both v7x cores + DMA overlap
        divisors = [d for d in range(1, B + 1) if B % d == 0 and d <= cap]
        aligned = [d for d in divisors if (d * Tp) % _LANE == 0]  # MXU-aligned M
        block_b = max(aligned) if aligned else max(divisors)
    assert B % block_b == 0, "block_b must divide B"
    grid = (B // block_b,)

    kernel = functools.partial(mixer_kernel, h_real=H, compute_dtype=cdt)

    out = pl.pallas_call(
        kernel,
        out_shape=jax.ShapeDtypeStruct((B, Tp, Hp), x.dtype),
        grid_spec=pltpu.PrefetchScalarGridSpec(
            num_scalar_prefetch=0,
            grid=grid,
            in_specs=[pl.BlockSpec((block_b, Tp, Hp), lambda b: (b, 0, 0))]
            + [_const_weight_spec(w.shape) for w in weight_args],
            out_specs=pl.BlockSpec((block_b, Tp, Hp), lambda b: (b, 0, 0)),
        ),
        compiler_params=pltpu.CompilerParams(
            dimension_semantics=("parallel",),
            vmem_limit_bytes=int(vmem_limit),
        ),
    )(xp, *weight_args)

    if Tp != T or Hp != H:
        out = out[:, :T, :H]
    return out


def make_params(key, hidden_dim, hidden_inter_dim, token_dim, token_inter_dim):
    ks = jax.random.split(key, 8)
    f32 = jnp.float32

    def lin(k, out_dim, in_dim):
        kw, kb = jax.random.split(k)
        bound = 1.0 / np.sqrt(in_dim)
        w = jax.random.uniform(kw, (out_dim, in_dim), f32, -bound, bound)
        b = jax.random.uniform(kb, (out_dim,), f32, -bound, bound)
        return w, b

    tw1, tb1 = lin(ks[0], token_inter_dim, token_dim)
    tw2, tb2 = lin(ks[1], token_dim, token_inter_dim)
    cw1, cb1 = lin(ks[2], hidden_inter_dim, hidden_dim)
    cw2, cb2 = lin(ks[3], hidden_dim, hidden_inter_dim)

    return {
        "g1": jnp.ones((1, hidden_dim), f32),
        "be1": jnp.zeros((1, hidden_dim), f32),
        "g2": jnp.ones((1, hidden_dim), f32),
        "be2": jnp.zeros((1, hidden_dim), f32),
        # token MLP weights used in transposed form; biases as column vectors
        "tw1": tw1, "tb1": tb1[:, None],
        "tw2": tw2, "tb2": tb2[:, None],
        # channel MLP weights pre-transposed so kernel does z @ W.T directly
        "cw1t": cw1.T, "cb1": cb1[None, :],
        "cw2t": cw2.T, "cb2": cb2[None, :],
    }


def mixer_layer_ref(x, params):
    """Pure-JAX reference mirroring the PyTorch forward (eval mode)."""
    def ln(v, g, b):
        mu = jnp.mean(v, axis=-1, keepdims=True)
        var = jnp.mean((v - mu) ** 2, axis=-1, keepdims=True)
        return (v - mu) / jnp.sqrt(var + 1e-5) * g[0] + b[0]

    y = ln(x, params["g1"], params["be1"])
    yt = jnp.swapaxes(y, 1, 2)                                      # (B, H, T)
    h = _gelu_exact(yt @ params["tw1"].T + params["tb1"][:, 0])
    yt = h @ params["tw2"].T + params["tb2"][:, 0]
    y = jnp.swapaxes(yt, 1, 2)                                      # (B, T, H)
    z = ln(x + y, params["g2"], params["be2"])
    h2 = _gelu_exact(z @ params["cw1t"] + params["cb1"][0])
    z = h2 @ params["cw2t"] + params["cb2"][0]
    return x + y + z


if __name__ == "__main__":
    B, T, H = 2, 16, 32            # batch, token_dim (seq), hidden_dim
    Ti, Hi = 24, 48                # token_inter_dim, hidden_inter_dim

    key = jax.random.PRNGKey(0)
    kx, kp = jax.random.split(key)
    x = jax.random.normal(kx, (B, T, H), jnp.float32)
    params = make_params(kp, H, Hi, T, Ti)

    ref = mixer_layer_ref(x, params)

    # 1) f32 MXU operands, auto block_b -> 2 parallel grid steps (bb == 1 path)
    out_f32 = jax.block_until_ready(
        mixer_layer(x, params, compute_dtype=jnp.float32))
    np.testing.assert_allclose(np.asarray(out_f32), np.asarray(ref),
                               rtol=1e-4, atol=1e-4)

    # 2) f32, whole batch folded into one block (bb > 1 merged token-matmul path)
    out_f32b = jax.block_until_ready(
        mixer_layer(x, params, block_b=B, compute_dtype=jnp.float32))
    np.testing.assert_allclose(np.asarray(out_f32b), np.asarray(ref),
                               rtol=1e-4, atol=1e-4)

    # 3) default bf16 MXU operands (fast path on all generations); looser tol
    out_bf16 = jax.block_until_ready(mixer_layer(x, params, block_b=B))
    np.testing.assert_allclose(np.asarray(out_bf16), np.asarray(ref),
                               rtol=5e-2, atol=1e-1)

    print("KERNEL_OK")
</pallas_src>

<mosaic_0001>
module attributes {stable_mosaic.version = 11 : i64} {
  func.func @mixer_kernel(%arg0: i32, %arg1: memref<1x16x128xf32, #tpu.memory_space<vmem>>, %arg2: memref<1x128xf32, #tpu.memory_space<vmem>>, %arg3: memref<1x128xf32, #tpu.memory_space<vmem>>, %arg4: memref<24x16xf32, #tpu.memory_space<vmem>>, %arg5: memref<24x1xf32, #tpu.memory_space<vmem>>, %arg6: memref<16x24xf32, #tpu.memory_space<vmem>>, %arg7: memref<16x1xf32, #tpu.memory_space<vmem>>, %arg8: memref<1x128xf32, #tpu.memory_space<vmem>>, %arg9: memref<1x128xf32, #tpu.memory_space<vmem>>, %arg10: memref<128x128xf32, #tpu.memory_space<vmem>>, %arg11: memref<1x128xf32, #tpu.memory_space<vmem>>, %arg12: memref<128x128xf32, #tpu.memory_space<vmem>>, %arg13: memref<1x128xf32, #tpu.memory_space<vmem>>, %arg14: memref<1x16x128xf32, #tpu.memory_space<vmem>>) attributes {dimension_semantics = [#tpu.dimension_semantics<parallel>], iteration_bounds = array<i64: 2>, scalar_prefetch = 0 : i64, scratch_operands = 0 : i64, tpu.core_type = #tpu.core_type<tc>, window_params = [{transform_indices = @transform_0, window_bounds = array<i64: 1, 16, 128>}, {pipeline_mode = #tpu.pipeline_mode<synchronous>, transform_indices = @transform_1, window_bounds = array<i64: 1, 128>}, {pipeline_mode = #tpu.pipeline_mode<synchronous>, transform_indices = @transform_2, window_bounds = array<i64: 1, 128>}, {pipeline_mode = #tpu.pipeline_mode<synchronous>, transform_indices = @transform_3, window_bounds = array<i64: 24, 16>}, {pipeline_mode = #tpu.pipeline_mode<synchronous>, transform_indices = @transform_4, window_bounds = array<i64: 24, 1>}, {pipeline_mode = #tpu.pipeline_mode<synchronous>, transform_indices = @transform_5, window_bounds = array<i64: 16, 24>}, {pipeline_mode = #tpu.pipeline_mode<synchronous>, transform_indices = @transform_6, window_bounds = array<i64: 16, 1>}, {pipeline_mode = #tpu.pipeline_mode<synchronous>, transform_indices = @transform_7, window_bounds = array<i64: 1, 128>}, {pipeline_mode = #tpu.pipeline_mode<synchronous>, transform_indices = @transform_8, window_bounds = array<i64: 1, 128>}, {pipeline_mode = #tpu.pipeline_mode<synchronous>, transform_indices = @transform_9, window_bounds = array<i64: 128, 128>}, {pipeline_mode = #tpu.pipeline_mode<synchronous>, transform_indices = @transform_10, window_bounds = array<i64: 1, 128>}, {pipeline_mode = #tpu.pipeline_mode<synchronous>, transform_indices = @transform_11, window_bounds = array<i64: 128, 128>}, {pipeline_mode = #tpu.pipeline_mode<synchronous>, transform_indices = @transform_12, window_bounds = array<i64: 1, 128>}, {transform_indices = @transform_13, window_bounds = array<i64: 1, 16, 128>}]} {
    %0 = tpu.iota {dimensions = array<i32: 1>} : vector<1x128xi32>
    %c32_i32 = arith.constant 32 : i32
    %1 = vector.broadcast %c32_i32 : i32 to vector<1x128xi32>
    %2 = arith.cmpi slt, %0, %1 : vector<1x128xi32>
    %c0 = arith.constant 0 : index
    %c0_0 = arith.constant 0 : index
    %c0_1 = arith.constant 0 : index
    %3 = vector.load %arg1[%c0, %c0_0, %c0_1] : memref<1x16x128xf32, #tpu.memory_space<vmem>>, vector<1x16x128xf32>
    %4 = vector.shape_cast %3 : vector<1x16x128xf32> to vector<16x128xf32>
    %c0_2 = arith.constant 0 : index
    %c0_3 = arith.constant 0 : index
    %5 = vector.load %arg2[%c0_2, %c0_3] : memref<1x128xf32, #tpu.memory_space<vmem>>, vector<1x128xf32>
    %c0_4 = arith.constant 0 : index
    %c0_5 = arith.constant 0 : index
    %6 = vector.load %arg3[%c0_4, %c0_5] : memref<1x128xf32, #tpu.memory_space<vmem>>, vector<1x128xf32>
    %cst = arith.constant 0.000000e+00 : f32
    %7 = vector.shape_cast %2 : vector<1x128xi1> to vector<1x128xi1>
    %8 = vector.broadcast %7 : vector<1x128xi1> to vector<16x128xi1>
    %9 = vector.broadcast %cst : f32 to vector<16x128xf32>
    %10 = arith.select %8, %4, %9 : vector<16x128xi1>, vector<16x128xf32>
    %cst_6 = arith.constant dense<0.000000e+00> : vector<16xf32>
    %11 = vector.multi_reduction <add>, %10, %cst_6 [1] : vector<16x128xf32> to vector<16xf32>
    %12 = vector.shape_cast %11 : vector<16xf32> to vector<16x1xf32>
    %cst_7 = arith.constant 3.125000e-02 : f32
    %13 = vector.broadcast %cst_7 : f32 to vector<16x1xf32>
    %14 = arith.mulf %12, %13 : vector<16x1xf32>
    %15 = vector.broadcast %14 : vector<16x1xf32> to vector<16x128xf32>
    %16 = arith.subf %10, %15 : vector<16x128xf32>
    %cst_8 = arith.constant 0.000000e+00 : f32
    %17 = vector.shape_cast %2 : vector<1x128xi1> to vector<1x128xi1>
    %18 = vector.broadcast %17 : vector<1x128xi1> to vector<16x128xi1>
    %19 = vector.broadcast %cst_8 : f32 to vector<16x128xf32>
    %20 = arith.select %18, %16, %19 : vector<16x128xi1>, vector<16x128xf32>
    %21 = arith.mulf %20, %20 : vector<16x128xf32>
    %cst_9 = arith.constant dense<0.000000e+00> : vector<16xf32>
    %22 = vector.multi_reduction <add>, %21, %cst_9 [1] : vector<16x128xf32> to vector<16xf32>
    %23 = vector.shape_cast %22 : vector<16xf32> to vector<16x1xf32>
    %cst_10 = arith.constant 3.125000e-02 : f32
    %24 = vector.broadcast %cst_10 : f32 to vector<16x1xf32>
    %25 = arith.mulf %23, %24 : vector<16x1xf32>
    %cst_11 = arith.constant 9.99999974E-6 : f32
    %26 = vector.broadcast %cst_11 : f32 to vector<16x1xf32>
    %27 = arith.addf %25, %26 : vector<16x1xf32>
    %28 = math.rsqrt %27 : vector<16x1xf32>
    %29 = vector.broadcast %28 : vector<16x1xf32> to vector<16x128xf32>
    %30 = arith.mulf %20, %29 : vector<16x128xf32>
    %31 = vector.broadcast %5 : vector<1x128xf32> to vector<16x128xf32>
    %32 = arith.mulf %30, %31 : vector<16x128xf32>
    %33 = vector.broadcast %6 : vector<1x128xf32> to vector<16x128xf32>
    %34 = arith.addf %32, %33 : vector<16x128xf32>
    %c0_12 = arith.constant 0 : index
    %c0_13 = arith.constant 0 : index
    %35 = vector.load %arg4[%c0_12, %c0_13] : memref<24x16xf32, #tpu.memory_space<vmem>>, vector<24x16xf32>
    %cst_14 = arith.constant dense<0.000000e+00> : vector<24x128xf32>
    %36 = tpu.matmul %35, %34, %cst_14 {dimension_numbers = #tpu.dot_dimension_numbers<[1], [0], [0], [1], [0, 0, 1, 1], [], []>} : vector<24x16xf32>, vector<16x128xf32>, vector<24x128xf32> -> vector<24x128xf32>
    %c0_15 = arith.constant 0 : index
    %c0_16 = arith.constant 0 : index
    %37 = vector.load %arg5[%c0_15, %c0_16] : memref<24x1xf32, #tpu.memory_space<vmem>>, vector<24x1xf32>
    %38 = vector.broadcast %37 : vector<24x1xf32> to vector<24x128xf32>
    %39 = arith.addf %36, %38 : vector<24x128xf32>
    %cst_17 = arith.constant 5.000000e-01 : f32
    %40 = vector.broadcast %cst_17 : f32 to vector<24x128xf32>
    %41 = arith.mulf %40, %39 : vector<24x128xf32>
    %cst_18 = arith.constant 0.707106769 : f32
    %42 = vector.broadcast %cst_18 : f32 to vector<24x128xf32>
    %43 = arith.mulf %39, %42 : vector<24x128xf32>
    %44 = math.erf %43 : vector<24x128xf32>
    %cst_19 = arith.constant 1.000000e+00 : f32
    %45 = vector.broadcast %cst_19 : f32 to vector<24x128xf32>
    %46 = arith.addf %45, %44 : vector<24x128xf32>
    %47 = arith.mulf %41, %46 : vector<24x128xf32>
    %c0_20 = arith.constant 0 : index
    %c0_21 = arith.constant 0 : index
    %48 = vector.load %arg6[%c0_20, %c0_21] : memref<16x24xf32, #tpu.memory_space<vmem>>, vector<16x24xf32>
    %cst_22 = arith.constant dense<0.000000e+00> : vector<16x128xf32>
    %49 = tpu.matmul %48, %47, %cst_22 {dimension_numbers = #tpu.dot_dimension_numbers<[1], [0], [0], [1], [0, 0, 1, 1], [], []>} : vector<16x24xf32>, vector<24x128xf32>, vector<16x128xf32> -> vector<16x128xf32>
    %c0_23 = arith.constant 0 : index
    %c0_24 = arith.constant 0 : index
    %50 = vector.load %arg7[%c0_23, %c0_24] : memref<16x1xf32, #tpu.memory_space<vmem>>, vector<16x1xf32>
    %51 = vector.broadcast %50 : vector<16x1xf32> to vector<16x128xf32>
    %52 = arith.addf %49, %51 : vector<16x128xf32>
    %53 = arith.addf %4, %52 : vector<16x128xf32>
    %c0_25 = arith.constant 0 : index
    %c0_26 = arith.constant 0 : index
    %54 = vector.load %arg8[%c0_25, %c0_26] : memref<1x128xf32, #tpu.memory_space<vmem>>, vector<1x128xf32>
    %c0_27 = arith.constant 0 : index
    %c0_28 = arith.constant 0 : index
    %55 = vector.load %arg9[%c0_27, %c0_28] : memref<1x128xf32, #tpu.memory_space<vmem>>, vector<1x128xf32>
    %cst_29 = arith.constant 0.000000e+00 : f32
    %56 = vector.shape_cast %2 : vector<1x128xi1> to vector<1x128xi1>
    %57 = vector.broadcast %56 : vector<1x128xi1> to vector<16x128xi1>
    %58 = vector.broadcast %cst_29 : f32 to vector<16x128xf32>
    %59 = arith.select %57, %53, %58 : vector<16x128xi1>, vector<16x128xf32>
    %cst_30 = arith.constant dense<0.000000e+00> : vector<16xf32>
    %60 = vector.multi_reduction <add>, %59, %cst_30 [1] : vector<16x128xf32> to vector<16xf32>
    %61 = vector.shape_cast %60 : vector<16xf32> to vector<16x1xf32>
    %cst_31 = arith.constant 3.125000e-02 : f32
    %62 = vector.broadcast %cst_31 : f32 to vector<16x1xf32>
    %63 = arith.mulf %61, %62 : vector<16x1xf32>
    %64 = vector.broadcast %63 : vector<16x1xf32> to vector<16x128xf32>
    %65 = arith.subf %59, %64 : vector<16x128xf32>
    %cst_32 = arith.constant 0.000000e+00 : f32
    %66 = vector.shape_cast %2 : vector<1x128xi1> to vector<1x128xi1>
    %67 = vector.broadcast %66 : vector<1x128xi1> to vector<16x128xi1>
    %68 = vector.broadcast %cst_32 : f32 to vector<16x128xf32>
    %69 = arith.select %67, %65, %68 : vector<16x128xi1>, vector<16x128xf32>
    %70 = arith.mulf %69, %69 : vector<16x128xf32>
    %cst_33 = arith.constant dense<0.000000e+00> : vector<16xf32>
    %71 = vector.multi_reduction <add>, %70, %cst_33 [1] : vector<16x128xf32> to vector<16xf32>
    %72 = vector.shape_cast %71 : vector<16xf32> to vector<16x1xf32>
    %cst_34 = arith.constant 3.125000e-02 : f32
    %73 = vector.broadcast %cst_34 : f32 to vector<16x1xf32>
    %74 = arith.mulf %72, %73 : vector<16x1xf32>
    %cst_35 = arith.constant 9.99999974E-6 : f32
    %75 = vector.broadcast %cst_35 : f32 to vector<16x1xf32>
    %76 = arith.addf %74, %75 : vector<16x1xf32>
    %77 = math.rsqrt %76 : vector<16x1xf32>
    %78 = vector.broadcast %77 : vector<16x1xf32> to vector<16x128xf32>
    %79 = arith.mulf %69, %78 : vector<16x128xf32>
    %80 = vector.broadcast %54 : vector<1x128xf32> to vector<16x128xf32>
    %81 = arith.mulf %79, %80 : vector<16x128xf32>
    %82 = vector.broadcast %55 : vector<1x128xf32> to vector<16x128xf32>
    %83 = arith.addf %81, %82 : vector<16x128xf32>
    %c0_36 = arith.constant 0 : index
    %c0_37 = arith.constant 0 : index
    %84 = vector.load %arg10[%c0_36, %c0_37] : memref<128x128xf32, #tpu.memory_space<vmem>>, vector<128x128xf32>
    %cst_38 = arith.constant dense<0.000000e+00> : vector<16x128xf32>
    %85 = tpu.matmul %83, %84, %cst_38 {dimension_numbers = #tpu.dot_dimension_numbers<[1], [0], [0], [1], [0, 0, 1, 1], [], []>} : vector<16x128xf32>, vector<128x128xf32>, vector<16x128xf32> -> vector<16x128xf32>
    %c0_39 = arith.constant 0 : index
    %c0_40 = arith.constant 0 : index
    %86 = vector.load %arg11[%c0_39, %c0_40] : memref<1x128xf32, #tpu.memory_space<vmem>>, vector<1x128xf32>
    %87 = vector.broadcast %86 : vector<1x128xf32> to vector<16x128xf32>
    %88 = arith.addf %85, %87 : vector<16x128xf32>
    %cst_41 = arith.constant 5.000000e-01 : f32
    %89 = vector.broadcast %cst_41 : f32 to vector<16x128xf32>
    %90 = arith.mulf %89, %88 : vector<16x128xf32>
    %cst_42 = arith.constant 0.707106769 : f32
    %91 = vector.broadcast %cst_42 : f32 to vector<16x128xf32>
    %92 = arith.mulf %88, %91 : vector<16x128xf32>
    %93 = math.erf %92 : vector<16x128xf32>
    %cst_43 = arith.constant 1.000000e+00 : f32
    %94 = vector.broadcast %cst_43 : f32 to vector<16x128xf32>
    %95 = arith.addf %94, %93 : vector<16x128xf32>
    %96 = arith.mulf %90, %95 : vector<16x128xf32>
    %c0_44 = arith.constant 0 : index
    %c0_45 = arith.constant 0 : index
    %97 = vector.load %arg12[%c0_44, %c0_45] : memref<128x128xf32, #tpu.memory_space<vmem>>, vector<128x128xf32>
    %cst_46 = arith.constant dense<0.000000e+00> : vector<16x128xf32>
    %98 = tpu.matmul %96, %97, %cst_46 {dimension_numbers = #tpu.dot_dimension_numbers<[1], [0], [0], [1], [0, 0, 1, 1], [], []>} : vector<16x128xf32>, vector<128x128xf32>, vector<16x128xf32> -> vector<16x128xf32>
    %c0_47 = arith.constant 0 : index
    %c0_48 = arith.constant 0 : index
    %99 = vector.load %arg13[%c0_47, %c0_48] : memref<1x128xf32, #tpu.memory_space<vmem>>, vector<1x128xf32>
    %100 = vector.broadcast %99 : vector<1x128xf32> to vector<16x128xf32>
    %101 = arith.addf %98, %100 : vector<16x128xf32>
    %102 = arith.addf %53, %101 : vector<16x128xf32>
    %103 = vector.shape_cast %102 : vector<16x128xf32> to vector<1x16x128xf32>
    %c0_49 = arith.constant 0 : index
    %c0_50 = arith.constant 0 : index
    %c0_51 = arith.constant 0 : index
    %104 = vector.load %arg14[%c0_49, %c0_50, %c0_51] : memref<1x16x128xf32, #tpu.memory_space<vmem>>, vector<1x16x128xf32>
    tpu.vector_store %arg14[%c0_49, %c0_50, %c0_51], %103 {strides = array<i32>} : memref<1x16x128xf32, #tpu.memory_space<vmem>>, vector<1x16x128xf32>,
    return
  }
  func.func @transform_0(%arg0: i32) -> (i32, i32, i32) {
    %c0_i32 = arith.constant 0 : i32
    %c0_i32_0 = arith.constant 0 : i32
    %c0_i32_1 = arith.constant 0 : i32
    return %arg0, %c0_i32, %c0_i32_0 : i32, i32, i32
  }
  func.func @transform_1(%arg0: i32) -> (i32, i32) {
    %c0_i32 = arith.constant 0 : i32
    %c0_i32_0 = arith.constant 0 : i32
    %c0_i32_1 = arith.constant 0 : i32
    return %c0_i32, %c0_i32_0 : i32, i32
  }
  func.func @transform_2(%arg0: i32) -> (i32, i32) {
    %c0_i32 = arith.constant 0 : i32
    %c0_i32_0 = arith.constant 0 : i32
    %c0_i32_1 = arith.constant 0 : i32
    return %c0_i32, %c0_i32_0 : i32, i32
  }
  func.func @transform_3(%arg0: i32) -> (i32, i32) {
    %c0_i32 = arith.constant 0 : i32
    %c0_i32_0 = arith.constant 0 : i32
    %c0_i32_1 = arith.constant 0 : i32
    return %c0_i32, %c0_i32_0 : i32, i32
  }
  func.func @transform_4(%arg0: i32) -> (i32, i32) {
    %c0_i32 = arith.constant 0 : i32
    %c0_i32_0 = arith.constant 0 : i32
    %c0_i32_1 = arith.constant 0 : i32
    return %c0_i32, %c0_i32_0 : i32, i32
  }
  func.func @transform_5(%arg0: i32) -> (i32, i32) {
    %c0_i32 = arith.constant 0 : i32
    %c0_i32_0 = arith.constant 0 : i32
    %c0_i32_1 = arith.constant 0 : i32
    return %c0_i32, %c0_i32_0 : i32, i32
  }
  func.func @transform_6(%arg0: i32) -> (i32, i32) {
    %c0_i32 = arith.constant 0 : i32
    %c0_i32_0 = arith.constant 0 : i32
    %c0_i32_1 = arith.constant 0 : i32
    return %c0_i32, %c0_i32_0 : i32, i32
  }
  func.func @transform_7(%arg0: i32) -> (i32, i32) {
    %c0_i32 = arith.constant 0 : i32
    %c0_i32_0 = arith.constant 0 : i32
    %c0_i32_1 = arith.constant 0 : i32
    return %c0_i32, %c0_i32_0 : i32, i32
  }
  func.func @transform_8(%arg0: i32) -> (i32, i32) {
    %c0_i32 = arith.constant 0 : i32
    %c0_i32_0 = arith.constant 0 : i32
    %c0_i32_1 = arith.constant 0 : i32
    return %c0_i32, %c0_i32_0 : i32, i32
  }
  func.func @transform_9(%arg0: i32) -> (i32, i32) {
    %c0_i32 = arith.constant 0 : i32
    %c0_i32_0 = arith.constant 0 : i32
    %c0_i32_1 = arith.constant 0 : i32
    return %c0_i32, %c0_i32_0 : i32, i32
  }
  func.func @transform_10(%arg0: i32) -> (i32, i32) {
    %c0_i32 = arith.constant 0 : i32
    %c0_i32_0 = arith.constant 0 : i32
    %c0_i32_1 = arith.constant 0 : i32
    return %c0_i32, %c0_i32_0 : i32, i32
  }
  func.func @transform_11(%arg0: i32) -> (i32, i32) {
    %c0_i32 = arith.constant 0 : i32
    %c0_i32_0 = arith.constant 0 : i32
    %c0_i32_1 = arith.constant 0 : i32
    return %c0_i32, %c0_i32_0 : i32, i32
  }
  func.func @transform_12(%arg0: i32) -> (i32, i32) {
    %c0_i32 = arith.constant 0 : i32
    %c0_i32_0 = arith.constant 0 : i32
    %c0_i32_1 = arith.constant 0 : i32
    return %c0_i32, %c0_i32_0 : i32, i32
  }
  func.func @transform_13(%arg0: i32) -> (i32, i32, i32) {
    %c0_i32 = arith.constant 0 : i32
    %c0_i32_0 = arith.constant 0 : i32
    %c0_i32_1 = arith.constant 0 : i32
    return %arg0, %c0_i32, %c0_i32_0 : i32, i32, i32
  }
}

</mosaic_0001>

<bundles_post_ra>
// kernel: tpu_custom_call.1
= control target key start
LH: loop header
LB: loop body
LE: loop exit
PB: predicated region body
PF: predicated region fallthrough
CT: control target
= control target key end

     0   :  { %s1899_s0 = inlined_call_operand.vmem [shape: f32[2,16,128], index: 0, kind: input, shape index: {}]   ;;  %s1900_s1 = inlined_call_operand.vmem [shape: f32[1,128], index: 1, kind: input, shape index: {}]   ;;  %s1901_s2 = inlined_call_operand.vmem [shape: f32[1,128], index: 2, kind: input, shape index: {}]   ;;  %s1902_s3 = inlined_call_operand.vmem [shape: f32[24,16], index: 3, kind: input, shape index: {}]   ;;  %s1903_s4 = inlined_call_operand.vmem [shape: f32[24,1], index: 4, kind: input, shape index: {}]   ;;  %s1904_s5 = inlined_call_operand.vmem [shape: f32[16,24], index: 5, kind: input, shape index: {}]   ;;  %s1905_s6 = inlined_call_operand.vmem [shape: f32[16,1], index: 6, kind: input, shape index: {}]   ;;  %s1906_s7 = inlined_call_operand.vmem [shape: f32[1,128], index: 7, kind: input, shape index: {}]   ;;  %s1907_s8 = inlined_call_operand.vmem [shape: f32[1,128], index: 8, kind: input, shape index: {}]   ;;  %s1908_s9 = inlined_call_operand.hbm [shape: f32[128,128], index: 9, kind: input, shape index: {}]   ;;  %s1909_s10 = inlined_call_operand.vmem [shape: f32[1,128], index: 10, kind: input, shape index: {}]   ;;  %s1910_s11 = inlined_call_operand.hbm [shape: f32[128,128], index: 11, kind: input, shape index: {}]   ;;  %s1911_s12 = inlined_call_operand.vmem [shape: f32[1,128], index: 12, kind: input, shape index: {}]   ;;  %s1912_s13 = inlined_call_operand.hbm [shape: f32[2,16,128], index: 13, kind: output, shape index: {}]  }
   0x1   :  { %1923 = sst [smem:[#allocation17_spill]] %s1912_s13 }
   0x2   :  { %18 = vsyncpa [#allocation3], 0 }
   0x3   :  { %19 = vsyncpa [#allocation6], 0 }
   0x4   :  { %20 = vsyncpa [#allocation4], 0 }
   0x5   :  { %22 = vsyncpa [#allocation4 + $0x1], 0  ;;  %s1631_s25 = smov 0   ;;  %s1633_s26 = smov 0  }
   0x6   :  { %s1635_s27 = smov 0   ;;  %s1637_s28 = smov 0  }
   0x7 LB: > { %1924 = sst [smem:[#allocation11_spill]] %s1536_s25  ;;  %s1652_s29 = sadd.s32 4294967295, %s1548_s28   ;;  %s1548_s28 = sphi %s1637_s28, %s1946_s28   ;;  %s1544_s27 = sphi %s1635_s27, %s1948_s27   ;;  %s1540_s26 = sphi %s1633_s26, %s1950_s26   ;;  %s1536_s25 = sphi %s1631_s25, %s1949_s25  }
   0x8   : > { %1925 = sst [smem:[#allocation12_spill]] %s1544_s27  ;;  %s1096_s30 = sadd.s32 4294967294, %s1548_s28  }
   0x9   : > { %1926 = sst [smem:[#allocation13_spill]] %s1548_s28  ;;  %s1656_s14 = sadd.s32 1, %s1548_s28  }
   0xa   : > { %1927 = sst [smem:[#allocation14_spill]] %s1656_s14  ;;  %s313_s15 = sadd.s32 1, %s1544_s27 }
   0xb   : > { %s310_s16 = ssub.s32 %s1548_s28, %s1656_s14  ;;  %p323_p0 = scmp.ne.s32.totalorder %s1544_s27, %s1540_s26 }
   0xc   : > { %p311_p1 = scmp.eq.s32.totalorder %s310_s16, 0  ;;  %p324_p2 = scmp.eq.s32.totalorder %s1652_s29, 1 }
   0xd   : > { %p329_p3 = scmp.ne.s32.totalorder %s1540_s26, %s1536_s25  ;;  %p330_p4 = scmp.eq.s32.totalorder %s1096_s30, 1 }
   0xe   : > { %s1667_s17 = scalar_select %p311_p1, %s1544_s27, %s313_s15  }
   0xf   : > { %p1669_p5 = por %p324_p2, %p323_p0  ;;  %p1673_p6 = por %p330_p4, %p329_p3 }
  0x10   : > { %1928 = sst [smem:[#allocation15_spill]] %s1667_s17  ;;  %p1097_p7 = scmp.ge.s32.totalorder %s1548_s28, 1 }
  0x11   : > { %s1929_s18 = scalar_select %p1669_p5, 1, 0 }
  0x12   : > { %s1930_s19 = scalar_select %p1673_p6, 1, 0 }
  0x13   : > { %p337_p8 = scmp.lt.s32.totalorder %s1548_s28, 3  ;;  %p1917_p9 = scmp.eq.s32.totalorder %s1652_s29, 0 }
  0x14   : > { %1931 = sst [smem:[#allocation16_spill]] %s1930_s19  ;;  %s1550_s21 = smov [#allocation2]  }
  0x15   : > { %p1680_p10 = pnand %p1097_p7, %p337_p8  ;;  %s373_s22 = sshll.u32 %s1550_s21, 4  ;;  %s374_s22 = int_to_ptr.vmem [resolvable:$true] %s373_s22 }
  0x16   : > { %s1551_s24 = smov [#allocation5]   ;;  %s1422_s17 = scalar_lea.hbm %s1908_s9, 2048 }
  0x17   : > { %s1932_s20 = scalar_select %p1680_p10, 1, 0 }
  0x18   : > { %p1344_p11 = pneg %p1680_p10  ;;  %s389_s30 = sshll.u32 %s1551_s24, 4  ;;  %s1692_s30 = int_to_ptr.vmem [resolvable:$true] %s389_s30 }
  0x19   : > { %p1423_p13 = scmp.ne.s32.totalorder %s1908_s9, %s1422_s17  ;;  %p1429_p3 = scmp.lt.u32.totalorder %s1422_s17, %s1908_s9 }
  0x1a   : > { %p1688_p12 = pnand %p1917_p9, %p1344_p11 }
  0x1c   : > { %p1424_p0 = pneg %p1688_p12 }
  0x1e   : > { %p1425_p1 = pnand %p1424_p0, %p1423_p13 }
  0x20   : > { %p1426_p2 = pneg %p1425_p1 }
  0x22   : > { %p1431_p4 = pnand %p1429_p3, %p1426_p2 }
  0x24   : > { %1434 = shalt.err (!%p1431_p4)
}
  0x25   : > { %s1435_s24 = scalar_lea.vmem %s374_s22, 2048  ;;  %p1443_p9 = scmp.lt.s32.totalorder %s374_s22, %s374_s22 }
  0x26   : > { %p1436_p7 = scmp.ne.s32.totalorder %s374_s22, %s1435_s24  ;;  %p1444_p6 = scmp.lt.s32.totalorder %s1435_s24, %s1435_s24 }
  0x28   : > { %p1438_p8 = pnand %p1436_p7, %p1424_p0  ;;  %p1445_p5 = por %p1444_p6, %p1443_p9 }
  0x2a   : > { %p1439_p11 = pneg %p1438_p8 }
  0x2c   : > { %p1446_p10 = pnand %p1445_p5, %p1439_p11 }
  0x2e   : > { %1449 = shalt.err (!%p1446_p10)
}
  0x2f   : > { %s1552_s27 = smov 128   ;;  %s1553_s15 = smov 8  }
  0x30   : > { %1347 = dma.hbm_to_vmem [thread:$0]  (!%p1688_p12), %s1908_s9, 2048, %s374_s22, [#allocation3], %s1552_s27, %s1552_s27, %s1553_s15  }
  0x31   : > { %s1450_s21 = scalar_lea.hbm %s1910_s11, 2048 }
  0x32   : > { %p1451_p13 = scmp.ne.s32.totalorder %s1910_s11, %s1450_s21  ;;  %p1457_p9 = scmp.lt.u32.totalorder %s1450_s21, %s1910_s11 }
  0x34   : > { %p1453_p5 = pnand %p1451_p13, %p1424_p0 }
  0x36   : > { %p1454_p6 = pneg %p1453_p5 }
  0x38   : > { %p1459_p10 = pnand %p1457_p9, %p1454_p6 }
  0x3a   : > { %1462 = shalt.err (!%p1459_p10)
}
  0x3b   : > { %s1463_s22 = scalar_lea.vmem %s1692_s30, 2048  ;;  %p1471_p4 = scmp.lt.s32.totalorder %s1692_s30, %s1692_s30 }
  0x3c   : > { %p1464_p1 = scmp.ne.s32.totalorder %s1692_s30, %s1463_s22  ;;  %p1472_p7 = scmp.lt.s32.totalorder %s1463_s22, %s1463_s22 }
  0x3e   : > { %p1466_p2 = pnand %p1464_p1, %p1424_p0  ;;  %p1473_p8 = por %p1472_p7, %p1471_p4 }
  0x40   : > { %p1467_p3 = pneg %p1466_p2 }
  0x42   : > { %p1474_p11 = pnand %p1473_p8, %p1467_p3 }
  0x44   : > { %1477 = shalt.err (!%p1474_p11)
}
  0x45   : > { %1350 = dma.hbm_to_vmem [thread:$0]  (!%p1688_p12), %s1910_s11, 2048, %s1692_s30, [#allocation6], %s1552_s27, %s1552_s27, %s1553_s15  }
  0x46   : > { %p1934_p13 = scmp.ne.s32.totalorder %s1932_s20, 0 }
  0x47   : > { %p1935_p5 = scmp.eq.s32.totalorder (!%p1934_p13), %s1652_s29, 0 }
  0x48   : > { %416 = sbr.rel (%p1934_p13) target bundleno = 1655 (0x677), region = 72 }
  0x4f   : > { %1523 = dma.done.wait (%p1935_p5), [#allocation3], 2048   ;;  %p1936_p0 = pmov %p1935_p5 }
  0x51   : > { %1525 = vsyncadd (%p1936_p0), [#allocation3], 4294965248  ;;  %p1937_p6 = pmov %p1936_p0 }
  0x52   : > { %p1938_p9 = pmov %p1936_p0 }
  0x53   : > { %1527 = dma.done.wait (%p1937_p6), [#allocation6], 2048  }
  0x54   : > { %1529 = vsyncadd (%p1938_p9), [#allocation6], 4294965248  ;;  %p464_p10 = scmp.lt.s32.totalorder %s1652_s29, 1  ;;  %v469_v0 = vlaneseq  ;;  %v1554_v16 = vmov 0.0|0.0   ;;  %vm1555_vm1 = vmmov 0   ;;  %v1556_v17 = vmov 0.0  }
  0x55   : > { %1263 = vmatprep.subr.bf16.mxu0 %v1554_v16  ;;  %1175 = vmatprep.mubr.msk.f32.mxu0 %vm1555_vm1, %v1556_v17  ;;  %v524_v18 = vld [vmem:[%s1903_s4 + $0x8] sm:$0xff]  ;;  %v523_v19 = vld [vmem:[%s1903_s4] sm:$0xff]  ;;  %v1557_v20 = vmov 0   ;;  %v525_v21 = vld [vmem:[%s1903_s4 + $0x10] sm:$0xff]  ;;  %vm541_vm2 = vcmask 130048   ;;  %vm660_vm3 = vcmask 195584  }
  0x56   : > { %s465_s28 = scalar_select %p464_p10, %s1652_s29, 1  ;;  %v1753_v1 = vand.u32 127, %v469_v0  ;;  %1403 = vset.pattern.permute.xlu1 %v1557_v20  ;;  %1402 = vset.pattern.permute.xlu0 %v1557_v20  ;;  %v648_v22 = vld [vmem:[%s1905_s6] sm:$0xff]  ;;  %v649_v23 = vld [vmem:[%s1905_s6 + $0x8] sm:$0xff]  ;;  %v522_v43 = vld [vmem:[%s1902_s3 + $0x10] sm:$0xff] }
  0x57   : > { %v1107_v32 = vld [vmem:[%s1900_s1] ss:$0 sm:$0xff]  ;;  %v521_v42 = vld [vmem:[%s1902_s3 + $0x8] sm:$0xff]  ;;  %s461_s15 = sand.u32 1, %s1540_s26   ;;  %s1124_s24 = sshll.u32 %s1652_s29, 8 }
  0x58   : > { %s1123_s20 = sshll.u32 %s465_s28, 4  ;;  %vm471_vm0 = vcmp.lt.s32.totalorder %v1753_v1, 32  ;;  %v1108_v36 = vld [vmem:[%s1901_s2] ss:$0 sm:$0xff]  ;;  %s1104_s14 = sshll.u32 %s461_s15, 4 }
  0x59   : > { %s468_s27 = scalar_lea.vmem %s1899_s0, %s1123_s20  ;;  %v520_v41 = vld [vmem:[%s1902_s3] sm:$0xff]  ;;  %s463_s16 = scalar_lea.vmem [#allocation7], %s1104_s14 }
  0x5a   : > { %v1759_v2 = vld [vmem:[%s468_s27] sm:$0xff]  ;;  %v1761_v3 = vld [vmem:[%s468_s27 + $0x8] sm:$0xff]  ;;  %s1012_s21 = sshll.u32 %s463_s16, 4  ;;  %s1939_s25 = sld [smem:[#allocation17_spill]]  ;;  %s1850_s21 = int_to_ptr.vmem [resolvable:$true] %s1012_s21 }
  0x5b   : > { %v478_v4 = vsel %vm471_vm0, %v1759_v2, 0.0  ;;  %v479_v5 = vsel %vm471_vm0, %v1761_v3, 0.0  ;;  %v646_v44 = vld [vmem:[%s1904_s5] sm:$0xff]  ;;  %s1858_s29 = scalar_lea.sflag [#allocation4], %s461_s15  ;;  %s1478_s23 = scalar_lea.vmem %s1850_s21, 256 }
  0x5c   : > { %480 = vadd.xlane.f32.xlu0 %v478_v4  ;;  %1190 = vmatprep.mubr.msk.f32.mxu1 %vm660_vm3, %v646_v44  ;;  %v797_v44 = vld [vmem:[#allocation2 + $0x48] sm:$0xff]  ;;  %p1479_p12 = scmp.ne.s32.totalorder %s1850_s21, %s1478_s23  ;;  %p1941_p1 = scmp.ne.s32.totalorder %s1929_s18, 0 }
  0x5d   : > { %s1558_s30 = smov [#allocation7]  }
  0x5e   : > { %p1480_p2 = pnand %p1479_p12, %p1941_p1  ;;  %s1482_s27 = sshll.u32 %s1558_s30, 4  ;;  %s1483_s27 = int_to_ptr.vmem [resolvable:$false] %s1482_s27 }
  0x5f   : > { %s1484_s14 = scalar_lea.vmem %s1483_s27, 512  ;;  %p1485_p4 = scmp.lt.s32.totalorder %s1850_s21, %s1483_s27 }
  0x60   : > { %482 = vadd.xlane.f32.xlu0 %v479_v5  ;;  %s1940_s20 = smov %s1939_s25  ;;  %s1855_s28 = scalar_lea.hbm %s1939_s25, %s1124_s24 }
  0x61   : > { %p1481_p3 = pneg %p1480_p2  ;;  %p1486_p7 = scmp.lt.s32.totalorder %s1484_s14, %s1478_s23 }
  0x63   : > { %p1487_p8 = por %p1486_p7, %p1485_p4 }
  0x65   : > { %p1488_p11 = pnand %p1487_p8, %p1481_p3 }
  0x76   : > { %528 = vperm.xlu0 %1402, %v523_v19  }
  0xe9   : > { %v481_v6 = vpop.xlane.xlu0 %480 }
  0xea   : > { %v484_v7 = vmul.f32 0.03125, %v481_v6 }
  0xec   : > { %v486_v8 = vsub.f32 %v478_v4, %v484_v7 }
  0xed   : > { %v483_v9 = vpop.xlane.xlu0 %482 }
  0xee   : > { %v485_v10 = vmul.f32 0.03125, %v483_v9  ;;  %v488_v11 = vsel %vm471_vm0, %v486_v8, 0.0 }
  0xef   : > { %v490_v12 = vmul.f32 %v488_v11, %v488_v11 }
  0xf0   : > { %v487_v13 = vsub.f32 %v479_v5, %v485_v10 }
  0xf1   : > { %492 = vadd.xlane.f32.xlu1 %v490_v12  ;;  %v647_v12 = vld [vmem:[%s1904_s5 + $0x8] sm:$0xff] }
  0xf2   : > { %v489_v14 = vsel %vm471_vm0, %v487_v13, 0.0 }
  0xf3   : > { %v491_v15 = vmul.f32 %v489_v14, %v489_v14 }
  0xf5   : > { %494 = vadd.xlane.f32.xlu1 %v491_v15  ;;  %v529_v45 = vpop.permute.xlu0 %528 }
 0x106   : > { %533 = vperm.xlu1 %1403, %v524_v18  }
 0x10a   : > { %538 = vperm.xlu1 %1403, %v525_v21  }
 0x10e   : > { %652 = vperm.xlu1 %1403, %v648_v22  }
 0x112   : > { %657 = vperm.xlu1 %1403, %v649_v23   ;;  %v788_v23 = vld [vmem:[#allocation2] sm:$0xff] }
 0x17e   : > { %v493_v24 = vpop.xlane.xlu1 %492 }
 0x17f   : > { %v496_v25 = vmul.f32 0.03125, %v493_v24  ;;  %v789_v24 = vld [vmem:[#allocation2 + $0x8] sm:$0xff] }
 0x181   : > { %v498_v26 = vadd.f32 1e-05, %v496_v25  ;;  %v790_v25 = vld [vmem:[#allocation2 + $0x10] sm:$0xff] }
 0x182   : > { %v495_v27 = vpop.xlane.xlu1 %494 }
 0x183   : > { %1404 = vrsqrt.f32 %v498_v26  ;;  %v497_v28 = vmul.f32 0.03125, %v495_v27  ;;  %v1270_v26 = vpack.c.bf16 %v789_v24, %v788_v23  ;;  %v791_v27 = vld [vmem:[#allocation2 + $0x18] sm:$0xff]  ;;  %v904_v23 = vld [vmem:[#allocation5 + $0x40] sm:$0xff]  ;;  %v905_v24 = vld [vmem:[#allocation5 + $0x48] sm:$0xff] }
 0x185   : > { %v499_v29 = vadd.f32 1e-05, %v497_v28 }
 0x186   : > { %v534_v49 = vpop.permute.xlu1 %533 }
 0x187   : > { %1406 = vrsqrt.f32 %v499_v29 }
 0x18a   : > { %v539_v55 = vpop.permute.xlu1 %538 }
 0x18d   : > { %v1405_v30 = vpop.eup %1404 }
 0x18e   : > { %v502_v31 = vmul.f32 %v1405_v30, %v488_v11  ;;  %v653_v13 = vpop.permute.xlu1 %652 }
 0x190   : > { %v510_v35 = vmul.f32 %v1107_v32, %v502_v31 }
 0x191   : > { %v1407_v33 = vpop.eup %1406 }
 0x192   : > { %v503_v34 = vmul.f32 %v1407_v33, %v489_v14  ;;  %v518_v38 = vadd.f32 %v1108_v36, %v510_v35  ;;  %v658_v14 = vpop.permute.xlu1 %657 }
 0x194   : > { %v511_v37 = vmul.f32 %v1107_v32, %v503_v34 }
 0x196   : > { %v519_v39 = vadd.f32 %v1108_v36, %v511_v37  ;;  %v792_v37 = vld [vmem:[#allocation2 + $0x20] sm:$0xff] }
 0x198   : > { %v1264_v40 = vpack.c.bf16 %v519_v39, %v518_v38  ;;  %v793_v38 = vld [vmem:[#allocation2 + $0x28] sm:$0xff] }
 0x199   : > { %v1278_v39 = vpack.c.bf16 %v793_v38, %v792_v37 }
 0x19a   : > { %1265 = vmatpush3.bf16.msra.mxu0 %v1264_v40  ;;  %v794_v40 = vld [vmem:[#allocation2 + $0x30] sm:$0xff] }
 0x19b   : > { %1271 = vmatprep.subr.bf16.mxu0 %v1270_v26 }
 0x19d   : > { %1176 = vmatmul.mubr.msk.f32.vlgmr.msra.gmra.mrb[0].mxu0 %vm541_vm2, %v520_v41  ;;  %v795_v41 = vld [vmem:[#allocation2 + $0x38] sm:$0xff] }
 0x19e   : > { %1178 = vmatprep.mubr.msk.f32.mxu0 %vm1555_vm1, %v1556_v17  ;;  %1273 = vmatpush3.bf16.msra.mxu0 %v1270_v26  ;;  %v906_v26 = vld [vmem:[#allocation5 + $0x50] sm:$0xff] }
 0x1a1   : > { %1179 = vmatmul.mubr.msk.f32.gmra.mrb[2].mxu0 %vm541_vm2, %v521_v42  ;;  %v1282_v42 = vpack.c.bf16 %v795_v41, %v794_v40 }
 0x1a2   : > { %1181 = vmatprep.mubr.msk.f32.mxu0 %vm1555_vm1, %v1556_v17 }
 0x1a5   : > { %1182 = vmatmul.mubr.msk.f32.gmra.mrb[4].mxu0 %vm541_vm2, %v522_v43  ;;  %v796_v43 = vld [vmem:[#allocation2 + $0x40] sm:$0xff] }
 0x1a6   : > { %v1286_v1 = vpack.c.bf16 %v797_v44, %v796_v43 }
 0x270   : > { %v617_v46 = vpop.f32.mrb[0].mxu0 }
 0x271   : > { %v618_v47 = vadd.f32 %v617_v46, %v529_v45  ;;  %v1177_v48 = vpop.f32.mrb[1].mxu0  ;;  %v798_v45 = vld [vmem:[#allocation2 + $0x50] sm:$0xff]  ;;  %v799_v46 = vld [vmem:[#allocation2 + $0x58] sm:$0xff] }
 0x272   : > { %v1290_v48 = vpack.c.bf16 %v799_v46, %v798_v45 }
 0x273   : > { %v634_v50 = vmul.f32 0.70710677, %v618_v47  ;;  %v631_v63 = vmul.f32 0.5, %v618_v47  ;;  %v800_v47 = vld [vmem:[#allocation2 + $0x60] sm:$0xff] }
 0x274   : > { %v622_v51 = vpop.f32.mrb[2].mxu0 }
 0x275   : > { %1408 = verf.f32 %v634_v50  ;;  %v623_v52 = vadd.f32 %v622_v51, %v534_v49  ;;  %v1180_v53 = vpop.f32.mrb[3].mxu0  ;;  %v801_v49 = vld [vmem:[#allocation2 + $0x68] sm:$0xff]  ;;  %v802_v51 = vld [vmem:[#allocation2 + $0x70] sm:$0xff] }
 0x276   : > { %v1294_v50 = vpack.c.bf16 %v801_v49, %v800_v47  ;;  %v1117_v47 = vld [vmem:[%s1911_s12] ss:$0 sm:$0xff] }
 0x277   : > { %v635_v54 = vmul.f32 0.70710677, %v623_v52  ;;  %v632_v0 = vmul.f32 0.5, %v623_v52  ;;  %v803_v52 = vld [vmem:[#allocation2 + $0x78] sm:$0xff] }
 0x278   : > { %v627_v56 = vpop.f32.mrb[4].mxu0  ;;  %v1298_v53 = vpack.c.bf16 %v803_v52, %v802_v51 }
 0x279   : > { %1410 = verf.f32 %v635_v54  ;;  %v628_v57 = vadd.f32 %v627_v56, %v539_v55  ;;  %v1183_v58 = vpop.f32.mrb[5].mxu0  ;;  %v896_v54 = vld [vmem:[#allocation5] sm:$0xff]  ;;  %v897_v55 = vld [vmem:[#allocation5 + $0x8] sm:$0xff]  ;;  %v898_v56 = vld [vmem:[#allocation5 + $0x10] sm:$0xff] }
 0x27a   : > { %v899_v58 = vld [vmem:[#allocation5 + $0x18] sm:$0xff] }
 0x27b   : > { %v636_v59 = vmul.f32 0.70710677, %v628_v57  ;;  %v633_v8 = vmul.f32 0.5, %v628_v57  ;;  %v1302_v57 = vpack.c.bf16 %v897_v55, %v896_v54 }
 0x27d   : > { %1412 = verf.f32 %v636_v59  ;;  %v1306_v59 = vpack.c.bf16 %v899_v58, %v898_v56 }
 0x27f   : > { %v1409_v60 = vpop.eup %1408 }
 0x280   : > { %v640_v61 = vadd.f32 1.0, %v1409_v60  ;;  %v900_v60 = vld [vmem:[#allocation5 + $0x20] sm:$0xff] }
 0x282   : > { %v643_v5 = vmul.f32 %v640_v61, %v631_v63  ;;  %v901_v61 = vld [vmem:[#allocation5 + $0x28] sm:$0xff] }
 0x283   : > { %v1411_v62 = vpop.eup %1410 }
 0x284   : > { %v641_v4 = vadd.f32 1.0, %v1411_v62  ;;  %v1310_v62 = vpack.c.bf16 %v901_v61, %v900_v60 }
 0x286   : > { %v644_v6 = vmul.f32 %v641_v4, %v632_v0 }
 0x287   : > { %v1413_v7 = vpop.eup %1412 }
 0x288   : > { %v642_v9 = vadd.f32 1.0, %v1413_v7  ;;  %v1266_v10 = vpack.c.bf16 %v644_v6, %v643_v5 }
 0x28a   : > { %1267 = vmatprep.subr.bf16.mxu1 %v1266_v10  ;;  %v645_v11 = vmul.f32 %v642_v9, %v633_v8  ;;  %v1114_v9 = vld [vmem:[%s1906_s7] ss:$0 sm:$0xff] }
 0x28b   : > { %1269 = vmatpush3.bf16.msra.mxu1 %v1266_v10 }
 0x28c   : > { %1188 = vmatprep.subr.mxu1 %v645_v11 }
 0x28f   : > { %1189 = vmatpush3.msra.mxu1 %v645_v11  ;;  %v1115_v11 = vld [vmem:[%s1907_s8] ss:$0 sm:$0xff] }
 0x290   : > { %1191 = vmatmul.mubr.msk.f32.vlgmr.msra.gmra.mrb[0].mxu1 %vm660_vm3, %v647_v12  ;;  %1303 = vmatprep.subr.bf16.mxu1 %v1302_v57 }
 0x291   : > { %1305 = vmatpush3.bf16.msra.mxu1 %v1302_v57 }
 0x292   : > { %1307 = vmatprep.subr.bf16.mxu1 %v1306_v59 }
 0x295   : > { %1309 = vmatpush3.bf16.msra.mxu1 %v1306_v59 }
 0x296   : > { %1311 = vmatprep.subr.bf16.mxu1 %v1310_v62 }
 0x299   : > { %1313 = vmatpush3.bf16.msra.mxu1 %v1310_v62 }
 0x363   : > { %v1192_v15 = vpop.f32.mrb[0].mxu1 }
 0x364   : > { %v739_v16 = vadd.f32 %v1192_v15, %v658_v14  ;;  %v733_v17 = vpop.f32.mrb[1].mxu1 }
 0x365   : > { %v734_v18 = vadd.f32 %v733_v17, %v653_v13 }
 0x366   : > { %v1815_v19 = vadd.f32 %v739_v16, %v1761_v3  ;;  %v1274_v3 = vpack.c.bf16 %v791_v27, %v790_v25  ;;  %v1318_v25 = vpack.c.bf16 %v905_v24, %v904_v23  ;;  %v907_v27 = vld [vmem:[#allocation5 + $0x58] sm:$0xff] }
 0x367   : > { %v1818_v20 = vadd.f32 %v734_v18, %v1759_v2  ;;  %v902_v18 = vld [vmem:[#allocation5 + $0x30] sm:$0xff] }
 0x368   : > { %v747_v21 = vsel %vm471_vm0, %v1815_v19, 0.0  ;;  %1275 = vmatprep.subr.bf16.mxu0 %v1274_v3 }
 0x369   : > { %750 = vadd.xlane.f32.xlu0 %v747_v21  ;;  %v746_v22 = vsel %vm471_vm0, %v1818_v20, 0.0  ;;  %1277 = vmatpush3.bf16.msra.mxu0 %v1274_v3  ;;  %v1322_v3 = vpack.c.bf16 %v907_v27, %v906_v26 }
 0x36a   : > { %748 = vadd.xlane.f32.xlu1 %v746_v22  ;;  %1279 = vmatprep.subr.bf16.mxu0 %v1278_v39 }
 0x36d   : > { %1281 = vmatpush3.bf16.msra.mxu0 %v1278_v39 }
 0x36e   : > { %1283 = vmatprep.subr.bf16.mxu0 %v1282_v42 }
 0x371   : > { %1285 = vmatpush3.bf16.msra.mxu0 %v1282_v42 }
 0x372   : > { %1287 = vmatprep.subr.bf16.mxu0 %v1286_v1 }
 0x375   : > { %1289 = vmatpush3.bf16.msra.mxu0 %v1286_v1 }
 0x376   : > { %1291 = vmatprep.subr.bf16.mxu0 %v1290_v48 }
 0x379   : > { %1293 = vmatpush3.bf16.msra.mxu0 %v1290_v48 }
 0x37a   : > { %1295 = vmatprep.subr.bf16.mxu0 %v1294_v50 }
 0x37d   : > { %1297 = vmatpush3.bf16.msra.mxu0 %v1294_v50 }
 0x37e   : > { %1299 = vmatprep.subr.bf16.mxu0 %v1298_v53 }
 0x381   : > { %1301 = vmatpush3.bf16.msra.mxu0 %v1298_v53 }
 0x3f6   : > { %v751_v2 = vpop.xlane.xlu0 %750 }
 0x3f7   : > { %v753_v28 = vmul.f32 0.03125, %v751_v2  ;;  %v749_v29 = vpop.xlane.xlu1 %748  ;;  %v908_v2 = vld [vmem:[#allocation5 + $0x60] sm:$0xff] }
 0x3f8   : > { %v752_v30 = vmul.f32 0.03125, %v749_v29 }
 0x3f9   : > { %v755_v31 = vsub.f32 %v747_v21, %v753_v28  ;;  %v903_v21 = vld [vmem:[#allocation5 + $0x38] sm:$0xff]  ;;  %v909_v28 = vld [vmem:[#allocation5 + $0x68] sm:$0xff] }
 0x3fa   : > { %v754_v32 = vsub.f32 %v746_v22, %v752_v30  ;;  %v1314_v22 = vpack.c.bf16 %v903_v21, %v902_v18  ;;  %v1326_v29 = vpack.c.bf16 %v909_v28, %v908_v2  ;;  %v910_v30 = vld [vmem:[#allocation5 + $0x70] sm:$0xff] }
 0x3fb   : > { %v1830_v35 = vsel %vm471_vm0, %v755_v31, 0.0  ;;  %v911_v31 = vld [vmem:[#allocation5 + $0x78] sm:$0xff] }
 0x3fc   : > { %v756_v33 = vsel %vm471_vm0, %v754_v32, 0.0  ;;  %v759_v36 = vmul.f32 %v1830_v35, %v1830_v35  ;;  %1315 = vmatprep.subr.bf16.mxu1 %v1314_v22  ;;  %v1330_v32 = vpack.c.bf16 %v911_v31, %v910_v30 }
 0x3fd   : > { %v758_v34 = vmul.f32 %v756_v33, %v756_v33  ;;  %1317 = vmatpush3.bf16.msra.mxu1 %v1314_v22 }
 0x3fe   : > { %1319 = vmatprep.subr.bf16.mxu1 %v1318_v25 }
 0x3ff   : > { %760 = vadd.xlane.f32.xlu1 %v758_v34 }
 0x401   : > { %1321 = vmatpush3.bf16.msra.mxu1 %v1318_v25 }
 0x402   : > { %1323 = vmatprep.subr.bf16.mxu1 %v1322_v3 }
 0x403   : > { %762 = vadd.xlane.f32.xlu1 %v759_v36 }
 0x405   : > { %1325 = vmatpush3.bf16.msra.mxu1 %v1322_v3 }
 0x406   : > { %1327 = vmatprep.subr.bf16.mxu1 %v1326_v29 }
 0x409   : > { %1329 = vmatpush3.bf16.msra.mxu1 %v1326_v29 }
 0x40a   : > { %1331 = vmatprep.subr.bf16.mxu1 %v1330_v32 }
 0x40d   : > { %1333 = vmatpush3.bf16.msra.mxu1 %v1330_v32 }
 0x48c   : > { %v761_v63 = vpop.xlane.xlu1 %760 }
 0x48d   : > { %v764_v0 = vmul.f32 0.03125, %v761_v63 }
 0x48f   : > { %v766_v4 = vadd.f32 1e-05, %v764_v0 }
 0x490   : > { %v763_v5 = vpop.xlane.xlu1 %762 }
 0x491   : > { %1414 = vrsqrt.f32 %v766_v4  ;;  %v765_v6 = vmul.f32 0.03125, %v763_v5 }
 0x493   : > { %v767_v7 = vadd.f32 1e-05, %v765_v6 }
 0x495   : > { %1416 = vrsqrt.f32 %v767_v7 }
 0x49b   : > { %v1415_v8 = vpop.eup %1414 }
 0x49c   : > { %v770_v10 = vmul.f32 %v1415_v8, %v756_v33  ;;  %v1116_v33 = vld [vmem:[%s1909_s10] ss:$0 sm:$0xff] }
 0x49e   : > { %v778_v12 = vmul.f32 %v1114_v9, %v770_v10 }
 0x49f   : > { %v1417_v13 = vpop.eup %1416 }
 0x4a0   : > { %v771_v14 = vmul.f32 %v1417_v13, %v1830_v35  ;;  %v786_v15 = vadd.f32 %v1115_v11, %v778_v12 }
 0x4a2   : > { %v779_v16 = vmul.f32 %v1114_v9, %v771_v14  ;;  %1225 = vmatprep.mubr.f32.mxu0 %v786_v15 }
 0x4a4   : > { %v787_v17 = vadd.f32 %v1115_v11, %v779_v16 }
 0x4a6   : > { %1226 = vmatmul.mubr.f32.vlgmr.msra.gmra.mrb[6].mxu0 %v787_v17 }
 0x579   : > { %v1227_v34 = vpop.f32.mrb[6].mxu0 }
 0x57a   : > { %v883_v35 = vadd.f32 %v1227_v34, %v1116_v33  ;;  %v877_v36 = vpop.f32.mrb[7].mxu0 }
 0x57b   : > { %v878_v37 = vadd.f32 %v1116_v33, %v877_v36 }
 0x57c   : > { %v889_v38 = vmul.f32 0.70710677, %v883_v35  ;;  %v887_v1 = vmul.f32 0.5, %v883_v35 }
 0x57d   : > { %v888_v39 = vmul.f32 0.70710677, %v878_v37  ;;  %v886_v43 = vmul.f32 0.5, %v878_v37 }
 0x57e   : > { %1418 = verf.f32 %v889_v38 }
 0x57f   : > { %1420 = verf.f32 %v888_v39 }
 0x588   : > { %v1419_v40 = vpop.eup %1418 }
 0x589   : > { %v1421_v41 = vpop.eup %1420  ;;  %v893_v42 = vadd.f32 1.0, %v1419_v40 }
 0x58a   : > { %v892_v44 = vadd.f32 1.0, %v1421_v41 }
 0x58b   : > { %v895_v46 = vmul.f32 %v893_v42, %v887_v1 }
 0x58c   : > { %v894_v45 = vmul.f32 %v892_v44, %v886_v43 }
 0x58e   : > { %1260 = vmatprep.mubr.f32.mxu1 %v894_v45 }
 0x58f   : > { %1261 = vmatmul.mubr.f32.vlgmr.msra.gmra.mrb[2].mxu1 %v895_v46 }
 0x662   : > { %v1262_v48 = vpop.f32.mrb[2].mxu1 }
 0x663   : > { %v991_v49 = vadd.f32 %v1262_v48, %v1117_v47  ;;  %v985_v50 = vpop.f32.mrb[3].mxu1 }
 0x664   : > { %v986_v51 = vadd.f32 %v1117_v47, %v985_v50 }
 0x665   : > { %v995_v52 = vadd.f32 %v991_v49, %v1815_v19 }
 0x666   : > { %v994_v53 = vadd.f32 %v986_v51, %v1818_v20 }
 0x667   : > { %997 = vst [vmem:[%s463_s16 + $0x8] sm:$0xff] %v995_v52 }
 0x668   : > { %996 = vst [vmem:[%s463_s16] sm:$0xff] %v994_v53 }
 0x669   : > { %1491 = shalt.err (!%p1488_p11)
}
 0x66a   : > { %s1492_s15 = scalar_lea.hbm %s1855_s28, 256  ;;  %s1496_s16 = scalar_lea.hbm %s1940_s20, 512 }
 0x66b   : > { %p1493_p13 = scmp.ne.s32.totalorder %s1855_s28, %s1492_s15  ;;  %p1497_p6 = scmp.lt.u32.totalorder %s1855_s28, %s1940_s20 }
 0x66c   : > { %p1498_p9 = scmp.lt.u32.totalorder %s1496_s16, %s1492_s15  ;;  %p1500_p12 = scmp.lt.u32.totalorder %s1492_s15, %s1855_s28 }
 0x66d   : > { %p1494_p5 = pnand %p1493_p13, %p1941_p1 }
 0x66e   : > { %p1499_p10 = por %p1498_p9, %p1497_p6 }
 0x66f   : > { %p1495_p0 = pneg %p1494_p5 }
 0x670   : > { %p1501_p2 = por %p1500_p12, %p1499_p10 }
 0x672   : > { %p1502_p3 = pnand %p1501_p2, %p1495_p0 }
 0x674   : > { %1505 = shalt.err (!%p1502_p3)
}
 0x675   : > { %s1559_s13 = smov 128   ;;  %s1560_s25 = smov 8  }
 0x676   : > { %1342 = dma.vmem_to_hbm [thread:$0]  (%p1941_p1), %s1850_s21, 256, %s1855_s28, %s1858_s29, %s1559_s13, %s1559_s13, %s1560_s25  }
 0x677 PF: > { %s1942_s23 = sld [smem:[#allocation13_spill]]  ;;  %s1943_s30 = sld [smem:[#allocation11_spill]] }
 0x678   : > { %s1944_s27 = sld [smem:[#allocation16_spill]] }
 0x67d   : > { %p1359_p4 = scmp.ge.s32.totalorder %s1942_s23, 2  ;;  %s1027_s14 = sand.u32 1, %s1943_s30  }
 0x67e   : > { %p1945_p7 = scmp.ne.s32.totalorder %s1944_s27, 0  ;;  %s1028_s15 = scalar_lea.sflag [#allocation4], %s1027_s14 }
 0x680   : > { %p1352_p8 = pnand %p1359_p4, %p1945_p7 }
 0x682   : > { %1531 = dma.done.wait (!%p1352_p8), %s1028_s15, 256  }
 0x683   : > { %1533 = vsyncadd (!%p1352_p8), %s1028_s15, 4294967040  ;;  %s1946_s28 = sld [smem:[#allocation14_spill]]  ;;  %s1947_s17 = sld [smem:[#allocation12_spill]] }
 0x684   : > { %s1948_s27 = sld [smem:[#allocation15_spill]]  ;;  %s1949_s25 = smov %s1540_s26 }
 0x689   : > { %p25_p11 = scmp.ge.s32.totalorder %s1946_s28, 4   ;;  %s1950_s26 = smov %s1947_s17 }
 0x68b   :  { %27 = sbr.rel (!%p25_p11) target bundleno = 7 (0x7), region = 116 }
 0x692   :  { %1033 = vsyncpa [#allocation3], 1 }
 0x693   :  { %1035 = vsyncpa [#allocation3 + $0x1], 1 }
 0x694   :  { %1036 = vsyncpa [#allocation6], 1 }
 0x695   :  { %1037 = vsyncpa [#allocation4], 1 }
 0x696   :  { %1039 = vsyncpa [#allocation4 + $0x1], 1 }

</bundles_post_ra>
